<compile_context>
chip_gen: v7x
topology: tpu7x:2x2x1
jax: 0.10.0
libtpu: 0.0.40
codegen_flags: <defaults>
</compile_context>

<pallas_src>
import jax
import jax.numpy as jnp
from jax.experimental import pallas as pl
from jax.experimental.pallas import tpu as pltpu


def _round_up(x, m):
    return ((x + m - 1) // m) * m


def _auto_tile_rows(n_rows, in_dim, hidden, x_bytes, tile_budget=12 << 20):
    """Largest multiple-of-8 row tile whose buffers fit a ~12 MiB budget."""
    # double-buffered x tile + f32 hidden intermediate + double-buffered output row
    per_row = 2 * in_dim * x_bytes + hidden * 4 + 2 * 4
    tm = tile_budget // max(per_row, 1)
    tm = max(8, min((tm // 8) * 8, 1024))
    return int(min(tm, _round_up(n_rows, 8)))   # don't tile past the data


def _vmem_limit_bytes(tm, in_dim, hidden, x_bytes):
    # Weights/biases are pipeline-double-buffered even with constant index maps.
    fixed = 2 * (in_dim * hidden * x_bytes + 8 * hidden * 4 + hidden * 4 + 128 * 4)
    tiles = 2 * (tm * in_dim * x_bytes + tm * 4) + tm * hidden * 4
    needed = fixed + tiles
    # >= 32 MiB raises v5e's 16 MiB default scope; cap well under v7x's 64 MiB
    # physical VMEM so the request is valid on every generation.
    return int(min(max(32 << 20, needed * 2), 56 << 20))


def _score_kernel(x_ref, w1_ref, b1_ref, w2t_ref, b2_ref, o_ref):
    # x_ref  : (tm, Din)                 w1_ref: (Din, H)      b1_ref: (1, H)
    # w2t_ref: (8, H) (row 0 = W2^T)     b2_ref: (1, 1)
    # o_ref  : (1, 1, tm)  lane-dense scores for this row tile
    h = jnp.dot(x_ref[...], w1_ref[...], preferred_element_type=jnp.float32)
    h = jnp.maximum(h + b1_ref[...], 0.0)          # bias + ReLU (f32)
    # Dropout(p=0.3) -> identity (inference).
    # Second linear (out_dim == 1): contract the hidden (lane) axis of both
    # operands so the tm row-scores come out on the lane axis (lane-dense).
    scores = jax.lax.dot_general(
        w2t_ref[...], h,
        dimension_numbers=(((1,), (1,)), ((), ())),
        preferred_element_type=jnp.float32)        # (8, tm); row 0 is real
    out_row = scores[0:1, :] + b2_ref[...]         # (1, tm)
    o_ref[...] = out_row[None].astype(o_ref.dtype)  # (1, 1, tm)


def score_forward(x, w1, b1, w2, b2, *, tile_rows=None, compute_dtype=None):
    """x: (..., input_dim) -> (..., 1).  Weights stored as (in_features, out_features)."""
    in_dim = x.shape[-1]
    hidden = w1.shape[1]
    out_dim = w2.shape[1]
    if out_dim != 1:
        raise ValueError("this kernel specializes the Score head to output_dim == 1")

    lead_shape = x.shape[:-1]
    x2d = x.reshape(-1, in_dim)                    # metadata-only reshape
    n_rows = x2d.shape[0]

    if compute_dtype is not None:                  # optional bf16 path for x / W1
        x2d = x2d.astype(compute_dtype)
        w1 = w1.astype(compute_dtype)
    x_bytes = jnp.dtype(x2d.dtype).itemsize

    if tile_rows is None:
        tm = _auto_tile_rows(n_rows, in_dim, hidden, x_bytes)
    else:
        tm = max(8, (int(tile_rows) // 8) * 8)
    n_tiles = pl.cdiv(n_rows, tm)

    b1_2d = b1.reshape(1, hidden).astype(jnp.float32)
    b2_2d = b2.reshape(1, 1).astype(jnp.float32)
    # W2^T padded to 8 sublanes so the trans-B matmul never sees an M<8 operand.
    w2t = jnp.zeros((8, hidden), jnp.float32).at[0, :].set(w2[:, 0].astype(jnp.float32))

    out3 = pl.pallas_call(
        _score_kernel,
        out_shape=jax.ShapeDtypeStruct((n_tiles, 1, tm), jnp.float32),
        grid_spec=pltpu.PrefetchScalarGridSpec(
            num_scalar_prefetch=0,
            grid=(n_tiles,),
            in_specs=[
                pl.BlockSpec((tm, in_dim), lambda i: (i, 0)),       # x row tile
                pl.BlockSpec((in_dim, hidden), lambda i: (0, 0)),   # W1 (resident)
                pl.BlockSpec((1, hidden), lambda i: (0, 0)),        # b1
                pl.BlockSpec((8, hidden), lambda i: (0, 0)),        # padded W2^T
                pl.BlockSpec((1, 1), lambda i: (0, 0)),             # b2
            ],
            out_specs=pl.BlockSpec((1, 1, tm), lambda i: (i, 0, 0)),
        ),
        compiler_params=pltpu.CompilerParams(
            dimension_semantics=("parallel",),
            vmem_limit_bytes=_vmem_limit_bytes(tm, in_dim, hidden, x_bytes),
        ),
    )(x2d, w1, b1_2d, w2t, b2_2d)

    scores = out3.reshape(-1)[:n_rows]             # tiny: n_rows floats
    return scores.astype(x.dtype).reshape(*lead_shape, out_dim)


def init_score_params(key, input_dim, hidden_dim, output_dim=1):
    """Deterministic init mirroring nn.Linear default (uniform +/- 1/sqrt(fan_in))."""
    k1, k2, k3, k4 = jax.random.split(key, 4)
    lim1 = 1.0 / jnp.sqrt(input_dim)
    lim2 = 1.0 / jnp.sqrt(hidden_dim)
    w1 = jax.random.uniform(k1, (input_dim, hidden_dim), jnp.float32, -lim1, lim1)
    b1 = jax.random.uniform(k2, (hidden_dim,), jnp.float32, -lim1, lim1)
    w2 = jax.random.uniform(k3, (hidden_dim, output_dim), jnp.float32, -lim2, lim2)
    b2 = jax.random.uniform(k4, (output_dim,), jnp.float32, -lim2, lim2)
    return w1, b1, w2, b2


if __name__ == "__main__":
    key = jax.random.PRNGKey(0)
    kx1, kx2, kp = jax.random.split(key, 3)

    # 128-aligned feature/hidden dims (MXU-friendly per review), output_dim=1.
    input_dim, hidden_dim, output_dim = 128, 128, 1
    w1, b1, w2, b2 = init_score_params(kp, input_dim, hidden_dim, output_dim)

    def ref_fn(xx):
        return jnp.maximum(xx @ w1 + b1, 0.0) @ w2 + b2   # dropout = identity

    # Case 1: small batch, auto-picked tile (single grid step).
    x1 = jax.random.normal(kx1, (2, 8, input_dim), jnp.float32)
    out1 = jax.block_until_ready(score_forward(x1, w1, b1, w2, b2))
    assert out1.shape == (2, 8, output_dim), out1.shape
    assert jnp.allclose(out1, ref_fn(x1), atol=1e-4, rtol=1e-4)

    # Case 2: ragged row count (111 rows) with an explicit small tile -> 3 grid
    # steps whose last x block is masked (exercises the no-pad / no-slice path).
    x2 = jax.random.normal(kx2, (3, 37, input_dim), jnp.float32)
    out2 = jax.block_until_ready(score_forward(x2, w1, b1, w2, b2, tile_rows=48))
    assert out2.shape == (3, 37, output_dim), out2.shape
    assert jnp.allclose(out2, ref_fn(x2), atol=1e-4, rtol=1e-4)

    print("KERNEL_OK")
</pallas_src>

<mosaic_0001>
module attributes {stable_mosaic.version = 11 : i64} {
  func.func @_score_kernel(%arg0: i32, %arg1: memref<16x128xf32, #tpu.memory_space<vmem>>, %arg2: memref<128x128xf32, #tpu.memory_space<vmem>>, %arg3: memref<1x128xf32, #tpu.memory_space<vmem>>, %arg4: memref<8x128xf32, #tpu.memory_space<vmem>>, %arg5: memref<1x1xf32, #tpu.memory_space<vmem>>, %arg6: memref<1x1x16xf32, #tpu.memory_space<vmem>>) attributes {dimension_semantics = [#tpu.dimension_semantics<parallel>], iteration_bounds = array<i64: 1>, scalar_prefetch = 0 : i64, scratch_operands = 0 : i64, tpu.core_type = #tpu.core_type<tc>, window_params = [{transform_indices = @transform_0, window_bounds = array<i64: 16, 128>}, {pipeline_mode = #tpu.pipeline_mode<synchronous>, transform_indices = @transform_1, window_bounds = array<i64: 128, 128>}, {pipeline_mode = #tpu.pipeline_mode<synchronous>, transform_indices = @transform_2, window_bounds = array<i64: 1, 128>}, {pipeline_mode = #tpu.pipeline_mode<synchronous>, transform_indices = @transform_3, window_bounds = array<i64: 8, 128>}, {pipeline_mode = #tpu.pipeline_mode<synchronous>, transform_indices = @transform_4, window_bounds = array<i64: 1, 1>}, {transform_indices = @transform_5, window_bounds = array<i64: 1, 1, 16>}]} {
    %c0 = arith.constant 0 : index
    %c0_0 = arith.constant 0 : index
    %0 = vector.load %arg1[%c0, %c0_0] : memref<16x128xf32, #tpu.memory_space<vmem>>, vector<16x128xf32>
    %c0_1 = arith.constant 0 : index
    %c0_2 = arith.constant 0 : index
    %1 = vector.load %arg2[%c0_1, %c0_2] : memref<128x128xf32, #tpu.memory_space<vmem>>, vector<128x128xf32>
    %cst = arith.constant dense<0.000000e+00> : vector<16x128xf32>
    %2 = tpu.matmul %0, %1, %cst {dimension_numbers = #tpu.dot_dimension_numbers<[1], [0], [0], [1], [0, 0, 1, 1], [], []>} : vector<16x128xf32>, vector<128x128xf32>, vector<16x128xf32> -> vector<16x128xf32>
    %c0_3 = arith.constant 0 : index
    %c0_4 = arith.constant 0 : index
    %3 = vector.load %arg3[%c0_3, %c0_4] : memref<1x128xf32, #tpu.memory_space<vmem>>, vector<1x128xf32>
    %4 = vector.broadcast %3 : vector<1x128xf32> to vector<16x128xf32>
    %5 = arith.addf %2, %4 : vector<16x128xf32>
    %cst_5 = arith.constant 0.000000e+00 : f32
    %6 = vector.broadcast %cst_5 : f32 to vector<16x128xf32>
    %7 = arith.maximumf %5, %6 : vector<16x128xf32>
    %c0_6 = arith.constant 0 : index
    %c0_7 = arith.constant 0 : index
    %8 = vector.load %arg4[%c0_6, %c0_7] : memref<8x128xf32, #tpu.memory_space<vmem>>, vector<8x128xf32>
    %cst_8 = arith.constant dense<0.000000e+00> : vector<8x16xf32>
    %9 = tpu.matmul %8, %7, %cst_8 {dimension_numbers = #tpu.dot_dimension_numbers<[1], [1], [0], [0], [0, 0, 1, 0], [], []>} : vector<8x128xf32>, vector<16x128xf32>, vector<8x16xf32> -> vector<8x16xf32>
    %10 = vector.extract_strided_slice %9 {offsets = [0, 0], sizes = [1, 16], strides = [1, 1]} : vector<8x16xf32> to vector<1x16xf32>
    %c0_9 = arith.constant 0 : index
    %c0_10 = arith.constant 0 : index
    %11 = vector.load %arg5[%c0_9, %c0_10] : memref<1x1xf32, #tpu.memory_space<vmem>>, vector<1x1xf32>
    %12 = vector.broadcast %11 : vector<1x1xf32> to vector<1x16xf32>
    %13 = arith.addf %10, %12 : vector<1x16xf32>
    %14 = vector.shape_cast %13 : vector<1x16xf32> to vector<1x1x16xf32>
    %c0_11 = arith.constant 0 : index
    %c0_12 = arith.constant 0 : index
    %c0_13 = arith.constant 0 : index
    %15 = vector.load %arg6[%c0_11, %c0_12, %c0_13] : memref<1x1x16xf32, #tpu.memory_space<vmem>>, vector<1x1x16xf32>
    tpu.vector_store %arg6[%c0_11, %c0_12, %c0_13], %14 {strides = array<i32>} : memref<1x1x16xf32, #tpu.memory_space<vmem>>, vector<1x1x16xf32>,
    return
  }
  func.func @transform_0(%arg0: i32) -> (i32, i32) {
    %c0_i32 = arith.constant 0 : i32
    %c0_i32_0 = arith.constant 0 : i32
    return %arg0, %c0_i32 : i32, i32
  }
  func.func @transform_1(%arg0: i32) -> (i32, i32) {
    %c0_i32 = arith.constant 0 : i32
    %c0_i32_0 = arith.constant 0 : i32
    %c0_i32_1 = arith.constant 0 : i32
    return %c0_i32, %c0_i32_0 : i32, i32
  }
  func.func @transform_2(%arg0: i32) -> (i32, i32) {
    %c0_i32 = arith.constant 0 : i32
    %c0_i32_0 = arith.constant 0 : i32
    %c0_i32_1 = arith.constant 0 : i32
    return %c0_i32, %c0_i32_0 : i32, i32
  }
  func.func @transform_3(%arg0: i32) -> (i32, i32) {
    %c0_i32 = arith.constant 0 : i32
    %c0_i32_0 = arith.constant 0 : i32
    %c0_i32_1 = arith.constant 0 : i32
    return %c0_i32, %c0_i32_0 : i32, i32
  }
  func.func @transform_4(%arg0: i32) -> (i32, i32) {
    %c0_i32 = arith.constant 0 : i32
    %c0_i32_0 = arith.constant 0 : i32
    %c0_i32_1 = arith.constant 0 : i32
    return %c0_i32, %c0_i32_0 : i32, i32
  }
  func.func @transform_5(%arg0: i32) -> (i32, i32, i32) {
    %c0_i32 = arith.constant 0 : i32
    %c0_i32_0 = arith.constant 0 : i32
    %c0_i32_1 = arith.constant 0 : i32
    return %arg0, %c0_i32, %c0_i32_0 : i32, i32, i32
  }
}

</mosaic_0001>

<bundles_post_ra>
// kernel: tpu_custom_call.1
= control target key start
LH: loop header
LB: loop body
LE: loop exit
PB: predicated region body
PF: predicated region fallthrough
CT: control target
= control target key end

     0   :  { %s518_s0 = inlined_call_operand.hbm [shape: f32[16,128], index: 0, kind: input, shape index: {}]   ;;  %s519_s1 = inlined_call_operand.hbm [shape: f32[128,128], index: 1, kind: input, shape index: {}]   ;;  %s520_s2 = inlined_call_operand.vmem [shape: f32[1,128], index: 2, kind: input, shape index: {}]   ;;  %s521_s3 = inlined_call_operand.vmem [shape: f32[8,128], index: 3, kind: input, shape index: {}]   ;;  %s522_s4 = inlined_call_operand.<no memory space> [shape: f32[1,1], index: 4, kind: input, shape index: {}]   ;;  %s523_s5 = inlined_call_operand.hbm [shape: f32[1,1,16], index: 5, kind: output, shape index: {}]  }
   0x1   :  { %v10_v0 = vstv %s522_s4 }
   0x2   :  { %11 = vst [vmem:[#allocation2] sm:$0x1] %v10_v0 }
   0x3   :  { %12 = vsyncpa [#allocation4], 0 }
   0x4   :  { %13 = vsyncpa [#allocation7], 0 }
   0x5   :  { %14 = vsyncpa [#allocation5], 0  ;;  %s434_s20 = smov [#allocation3]   ;;  %s362_s24 = scalar_lea.hbm %s518_s0, 256 }
   0x6   :  { %s20_s21 = sshll.u32 %s434_s20, 4  ;;  %p363_p0 = scmp.ne.s32.totalorder %s518_s0, %s362_s24  ;;  %s21_s21 = int_to_ptr.vmem [resolvable:$true] %s20_s21 }
   0x7   :  { %p366_p1 = scmp.lt.u32.totalorder %s362_s24, %s518_s0 }
   0x9   :  { %p368_p2 = pnand %p366_p1, %p363_p0 }
   0xb   :  { %371 = shalt.err (!%p368_p2)
}
   0xc   :  { %s372_s4 = scalar_lea.vmem %s21_s21, 256  ;;  %p377_p4 = scmp.lt.s32.totalorder %s21_s21, %s21_s21 }
   0xd   :  { %p373_p3 = scmp.ne.s32.totalorder %s21_s21, %s372_s4  ;;  %p378_p5 = scmp.lt.s32.totalorder %s372_s4, %s372_s4 }
   0xf   :  { %p379_p6 = por %p378_p5, %p377_p4 }
  0x11   :  { %p380_p7 = pnand %p379_p6, %p373_p3 }
  0x13   :  { %383 = shalt.err (!%p380_p7)
}
  0x14   :  { %s435_s29 = smov 128   ;;  %s436_s30 = smov 8  }
  0x15   :  { %26 = dma.hbm_to_vmem [thread:$0]  %s518_s0, 256, %s21_s21, [#allocation4], %s435_s29, %s435_s29, %s436_s30  }
  0x16   :  { %s437_s8 = smov [#allocation6]   ;;  %s384_s12 = scalar_lea.hbm %s519_s1, 2048 }
  0x17   :  { %s32_s9 = sshll.u32 %s437_s8, 4  ;;  %p385_p8 = scmp.ne.s32.totalorder %s519_s1, %s384_s12  ;;  %s33_s9 = int_to_ptr.vmem [resolvable:$true] %s32_s9 }
  0x18   :  { %p388_p9 = scmp.lt.u32.totalorder %s384_s12, %s519_s1 }
  0x1a   :  { %p390_p10 = pnand %p388_p9, %p385_p8 }
  0x1c   :  { %393 = shalt.err (!%p390_p10)
}
  0x1d   :  { %s394_s17 = scalar_lea.vmem %s33_s9, 2048  ;;  %p399_p12 = scmp.lt.s32.totalorder %s33_s9, %s33_s9 }
  0x1e   :  { %p395_p11 = scmp.ne.s32.totalorder %s33_s9, %s394_s17  ;;  %p400_p13 = scmp.lt.s32.totalorder %s394_s17, %s394_s17 }
  0x20   :  { %p401_p0 = por %p400_p13, %p399_p12 }
  0x22   :  { %p402_p1 = pnand %p401_p0, %p395_p11 }
  0x24   :  { %405 = shalt.err (!%p402_p1)
}
  0x25   :  { %38 = dma.hbm_to_vmem [thread:$0]  %s519_s1, 2048, %s33_s9, [#allocation7], %s435_s29, %s435_s29, %s436_s30  }
  0x26   :  { %428 = dma.done.wait [#allocation4], 256  }
  0x27   :  { %429 = vsyncadd [#allocation4], 4294967040 }
  0x28   :  { %430 = dma.done.wait [#allocation7], 2048  }
  0x29   :  { %431 = vsyncadd [#allocation7], 4294965248  ;;  %v53_v1 = vld [vmem:[#allocation6] sm:$0xff]  ;;  %v54_v2 = vld [vmem:[#allocation6 + $0x8] sm:$0xff]  ;;  %v438_v27 = vmov 0.0|0.0   ;;  %vm439_vm0 = vmmov 0   ;;  %v230_v40 = vlaneseq }
  0x2a   :  { %v55_v3 = vld [vmem:[#allocation6 + $0x10] sm:$0xff]  ;;  %v317_v4 = vpack.c.bf16 %v54_v2, %v53_v1  ;;  %v56_v5 = vld [vmem:[#allocation6 + $0x18] sm:$0xff]  ;;  %v57_v7 = vld [vmem:[#allocation6 + $0x20] sm:$0xff]  ;;  %349 = vmatprep.subr.bf16.mxu1 %v438_v27  ;;  %v440_v28 = vmov 0.0   ;;  %v441_v30 = vmov 0   ;;  %s442_s22 = smov [#allocation8]  }
  0x2b   :  { %v321_v6 = vpack.c.bf16 %v56_v5, %v55_v3  ;;  %v58_v8 = vld [vmem:[#allocation6 + $0x28] sm:$0xff]  ;;  %v51_v10 = vld [vmem:[#allocation3] sm:$0xff]  ;;  %v60_v12 = vld [vmem:[#allocation6 + $0x38] sm:$0xff]  ;;  %314 = vmatprep.mubr.msk.f32.mxu1 %vm439_vm0, %v440_v28  ;;  %361 = vset.pattern.permute.xlu0 %v441_v30  ;;  %v231_v41 = vshrl.u32 %v230_v40, 7  ;;  %vm235_vm1 = vcmask 122880  }
  0x2c   :  { %318 = vmatprep.subr.bf16.mxu0 %v317_v4  ;;  %v325_v9 = vpack.c.bf16 %v58_v8, %v57_v7  ;;  %v59_v11 = vld [vmem:[#allocation6 + $0x30] sm:$0xff]  ;;  %307 = vmatprep.mubr.f32.mxu0 %v51_v10  ;;  %v61_v14 = vld [vmem:[#allocation6 + $0x40] sm:$0xff]  ;;  %v62_v15 = vld [vmem:[#allocation6 + $0x48] sm:$0xff] }
  0x2d   :  { %320 = vmatpush3.bf16.msra.mxu0 %v317_v4  ;;  %v329_v13 = vpack.c.bf16 %v60_v12, %v59_v11  ;;  %v333_v16 = vpack.c.bf16 %v62_v15, %v61_v14  ;;  %v63_v17 = vld [vmem:[#allocation6 + $0x50] sm:$0xff]  ;;  %v64_v18 = vld [vmem:[#allocation6 + $0x58] sm:$0xff]  ;;  %v65_v20 = vld [vmem:[#allocation6 + $0x60] sm:$0xff]  ;;  %v232_v42 = vsub.s32 0, %v231_v41 }
  0x2e   :  { %322 = vmatprep.subr.bf16.mxu0 %v321_v6  ;;  %v337_v19 = vpack.c.bf16 %v64_v18, %v63_v17  ;;  %v66_v21 = vld [vmem:[#allocation6 + $0x68] sm:$0xff]  ;;  %v67_v23 = vld [vmem:[#allocation6 + $0x70] sm:$0xff]  ;;  %v68_v24 = vld [vmem:[#allocation6 + $0x78] sm:$0xff] }
  0x2f   :  { %v341_v22 = vpack.c.bf16 %v66_v21, %v65_v20  ;;  %v345_v25 = vpack.c.bf16 %v68_v24, %v67_v23  ;;  %v52_v26 = vld [vmem:[#allocation3 + $0x8] sm:$0xff]  ;;  %v224_v29 = vld [vmem:[#allocation2] sm:$0x1] }
  0x30   :  { %227 = vperm.xlu0 %361, %v224_v29   ;;  %v253_v31 = vld [vmem:[%s520_s2] ss:$0 sm:$0xff]  ;;  %s243_s2 = sshll.u32 %s442_s22, 4  ;;  %s244_s2 = int_to_ptr.vmem [resolvable:$true] %s243_s2 }
  0x31   :  { %324 = vmatpush3.bf16.msra.mxu0 %v321_v6  ;;  %v153_v39 = vld [vmem:[%s521_s3] sm:$0xff]  ;;  %s406_s23 = scalar_lea.vmem %s244_s2, 16  ;;  %s410_s24 = scalar_lea.vmem %s244_s2, 32 }
  0x32   :  { %326 = vmatprep.subr.bf16.mxu0 %v325_v9  ;;  %p407_p2 = scmp.ne.s32.totalorder %s244_s2, %s406_s23  ;;  %p411_p3 = scmp.lt.s32.totalorder %s244_s2, %s244_s2 }
  0x33   :  { %p412_p4 = scmp.lt.s32.totalorder %s410_s24, %s406_s23 }
  0x35   :  { %328 = vmatpush3.bf16.msra.mxu0 %v325_v9  ;;  %p413_p5 = por %p412_p4, %p411_p3 }
  0x36   :  { %330 = vmatprep.subr.bf16.mxu0 %v329_v13 }
  0x37   :  { %p414_p6 = pnand %p413_p5, %p407_p2 }
  0x39   :  { %332 = vmatpush3.bf16.msra.mxu0 %v329_v13 }
  0x3a   :  { %334 = vmatprep.subr.bf16.mxu0 %v333_v16 }
  0x3d   :  { %336 = vmatpush3.bf16.msra.mxu0 %v333_v16 }
  0x3e   :  { %338 = vmatprep.subr.bf16.mxu0 %v337_v19 }
  0x41   :  { %340 = vmatpush3.bf16.msra.mxu0 %v337_v19 }
  0x42   :  { %342 = vmatprep.subr.bf16.mxu0 %v341_v22 }
  0x45   :  { %344 = vmatpush3.bf16.msra.mxu0 %v341_v22 }
  0x46   :  { %346 = vmatprep.subr.bf16.mxu0 %v345_v25 }
  0x49   :  { %348 = vmatpush3.bf16.msra.mxu0 %v345_v25 }
  0x4c   :  { %308 = vmatmul.mubr.f32.vlgmr.msra.gmra.mrb[0].mxu0 %v52_v26 }
  0xaf   :  { %v228_v43 = vpop.permute.xlu0 %227 }
  0xb0   :  { %v233_v44 = vrot.slane %v228_v43, %v232_v42 }
 0x11f   :  { %v309_v32 = vpop.f32.mrb[0].mxu0 }
 0x120   :  { %v148_v33 = vadd.f32 %v309_v32, %v253_v31  ;;  %v142_v34 = vpop.f32.mrb[1].mxu0 }
 0x121   :  { %v143_v35 = vadd.f32 %v253_v31, %v142_v34 }
 0x122   :  { %v152_v36 = vmax.f32 %v148_v33, 0.0 }
 0x123   :  { %v151_v37 = vmax.f32 %v143_v35, 0.0 }
 0x125   :  { %v350_v38 = vpack.c.bf16 %v152_v36, %v151_v37 }
 0x127   :  { %351 = vmatpush3.bf16.xpose.msra.mxu1 %v350_v38 }
 0x12e   :  { %315 = vmatmul.mubr.f32.vlgmr.msra.gmra.mrb[0].mxu1 %v153_v39 }
 0x201   :  { %v220_v45 = vpop.f32.mrb[0].mxu1 }
 0x202   :  { %v234_v46 = vadd.f32 %v233_v44, %v220_v45  ;;  %v316_v47 = vpop.f32.mrb[1].mxu1 }
 0x204   :  { %236 = vst.msk [vmem:[#allocation8] sm:$0x1] %vm235_vm1, %v234_v46 }
 0x205   :  { %417 = shalt.err (!%p414_p6)
}
 0x206   :  { %s418_s26 = scalar_lea.hbm %s523_s5, 16 }
 0x207   :  { %p419_p7 = scmp.ne.s32.totalorder %s523_s5, %s418_s26  ;;  %p422_p8 = scmp.lt.u32.totalorder %s418_s26, %s523_s5 }
 0x209   :  { %p424_p9 = pnand %p422_p8, %p419_p7 }
 0x20b   :  { %427 = shalt.err (!%p424_p9)
}
 0x20c   :  { %246 = dma.vmem_to_hbm [thread:$0]  %s244_s2, 16, %s523_s5, [#allocation5]  }
 0x20d   :  { %432 = dma.done.wait [#allocation5], 16  }
 0x20e   :  { %433 = vsyncadd [#allocation5], 4294967280 }
 0x20f   :  { %250 = vsyncpa [#allocation4], 1 }
 0x210   :  { %251 = vsyncpa [#allocation7], 1 }
 0x211   :  { %252 = vsyncpa [#allocation5], 1 }

</bundles_post_ra>
